<compile_context>
chip_gen: v6e
topology: v6e:2x2x1
jax: 0.10.0
libtpu: 0.0.40
codegen_flags: <defaults>
</compile_context>

<pallas_src>
import jax
import jax.numpy as jnp
from jax.experimental import pallas as pl
from jax.experimental.pallas import tpu as pltpu


def nonlocal_attn_kernel(th_ref, phi_ref, g_ref, xq_ref, ww_ref, shift_ref,
                         o_ref, m_sc, l_sc, acc_sc):
    """One (batch, q-tile, kv-tile) grid step of tiled NonLocal attention.

    th_ref   : (1, Ci, tq) bf16  theta tile (resident across the kv axis)
    phi_ref  : (1, tk, Ci) bf16  phi tile, pre-transposed layout (kv stream)
    g_ref    : (1, Ci, tk) bf16  g tile (kv stream)
    xq_ref   : (1, C,  tq) f32   x tile for the residual add (q-resident)
    ww_ref   : (C, Ci)     bf16  output projection with BN scale folded in
    shift_ref: (C, 1)      f32   folded conv-bias + BN shift
    scratch  : m_sc/l_sc (1, tq) f32, acc_sc (Ci, tq) f32
    """
    ki = pl.program_id(2)

    @pl.when(ki == 0)
    def _init():
        m_sc[...] = jnp.full_like(m_sc, -jnp.inf)
        l_sc[...] = jnp.zeros_like(l_sc)
        acc_sc[...] = jnp.zeros_like(acc_sc)

    # f[k, q] = <phi[:, k], theta[:, q]>  — natural (tk,Ci) @ (Ci,tq) matmul.
    f = jnp.dot(phi_ref[0], th_ref[0],
                preferred_element_type=jnp.float32)              # (tk, tq) f32

    # Online softmax over the kv (sublane) axis; state is lane-dense (1, tq).
    m_prev = m_sc[...]                                           # (1, tq)
    m_new = jnp.maximum(m_prev, jnp.max(f, axis=0, keepdims=True))
    alpha = jnp.exp(m_prev - m_new)                              # (1, tq)
    p = jnp.exp(f - m_new)                                       # (tk, tq) f32
    l_sc[...] = alpha * l_sc[...] + jnp.sum(p, axis=0, keepdims=True)
    # acc[c, q] += sum_k g[c, k] * p[k, q]  — natural (Ci,tk)@(tk,tq) matmul.
    acc_sc[...] = alpha * acc_sc[...] + jnp.dot(
        g_ref[0], p.astype(jnp.bfloat16), preferred_element_type=jnp.float32)
    m_sc[...] = m_new

    @pl.when(ki == pl.num_programs(2) - 1)
    def _finalize():
        inv_l = pl.reciprocal(l_sc[...], approx=True)            # (1, tq)
        y = (acc_sc[...] * inv_l).astype(jnp.bfloat16)           # (Ci, tq)
        # Output projection (+ folded BN) — natural (C,Ci)@(Ci,tq) matmul.
        w_y = jnp.dot(ww_ref[...], y, preferred_element_type=jnp.float32)
        o_ref[0] = (w_y + shift_ref[...] + xq_ref[0]).astype(o_ref.dtype)


def _vmem_budget_bytes(C, Ci, tq, tk):
    """Explicit VMEM budget: double-buffered blocks + weights + scratch +
    in-flight f/p temporaries, with ~50% headroom.  Clamped so default tiles
    stay well under v7x's 64 MiB while letting v5e/v6e use more."""
    blocks = 2 * (Ci * tq * 2 + tk * Ci * 2 + Ci * tk * 2      # theta/phi/g bf16
                  + C * tq * 4 + C * tq * 4)                   # xq + out f32
    weights = 2 * (C * Ci * 2 + C * 4)                         # ww_fold, shift
    scratch = Ci * tq * 4 + 2 * tq * 4
    temps = 3 * tk * tq * 4                                    # f, p, exp temps
    budget = int(1.5 * (blocks + weights + scratch + temps))
    return max(32 << 20, min(budget, 96 << 20))


def nonlocal_pallas(x_nchw, params, *, tq=256, tk=256, vmem_limit_bytes=None):
    """x_nchw: (B, C, H, W) float32 -> (B, C, H, W).

    tq/tk: query/key spatial tile sizes; must divide N = H*W.  256 fills the
    2x256x256 MXU on v6e/v7x; use 128 on v5e (4x128x128 MXU, bandwidth bound).
    """
    B, C, H, W = x_nchw.shape
    N = H * W
    Ci = params["wg"].shape[0]                     # inter_planes = C // 2

    tq = min(tq, N)
    tk = min(tk, N)
    # TODO(synk): pad N / mask the tail tile for ragged spatial sizes.
    assert N % tq == 0 and N % tk == 0, "H*W must be divisible by tile sizes"

    # NCHW is already (B, C, H*W) in memory: pure reshape, no transpose pass.
    x_bcn = x_nchw.reshape(B, C, N)

    # Fold BatchNorm2d (eval mode) + output-projection bias into the weights.
    eps = 1e-5
    bn_scale = params["bn_gamma"] / jnp.sqrt(params["bn_var"] + eps)     # (C,)
    bn_shift = params["bn_beta"] - params["bn_mean"] * bn_scale          # (C,)
    ww_fold = (bn_scale[:, None] * params["ww"]).astype(jnp.bfloat16)    # (C, Ci)
    shift = (params["bw"] * bn_scale + bn_shift).reshape(C, 1).astype(jnp.float32)

    # Hoisted 1x1 projections: computed ONCE (O(B*N*Ci*C) MACs) instead of
    # once per q-tile inside the kv loop.  phi is produced directly in the
    # (B, N, Ci) layout so every in-kernel matmul is a natural (M,K)x(K,N).
    theta_p = (jnp.einsum("ic,bcn->bin", params["wt"], x_bcn)
               + params["bt"][None, :, None]).astype(jnp.bfloat16)       # (B,Ci,N)
    g_p = (jnp.einsum("ic,bcn->bin", params["wg"], x_bcn)
           + params["bg"][None, :, None]).astype(jnp.bfloat16)           # (B,Ci,N)
    phi_p = (jnp.einsum("ic,bcn->bni", params["wp"], x_bcn)
             + params["bp"][None, None, :]).astype(jnp.bfloat16)         # (B,N,Ci)

    # Pad Ci up to a sublane multiple (8).  Zero pads are exact no-ops: they
    # contribute 0 to f (theta/phi pads are 0) and 0 to w_y (ww pad is 0).
    Ci_p = max(8, -(-Ci // 8) * 8)
    if Ci_p != Ci:
        dp = Ci_p - Ci
        theta_p = jnp.pad(theta_p, ((0, 0), (0, dp), (0, 0)))
        g_p = jnp.pad(g_p, ((0, 0), (0, dp), (0, 0)))
        phi_p = jnp.pad(phi_p, ((0, 0), (0, 0), (0, dp)))
        ww_fold = jnp.pad(ww_fold, ((0, 0), (0, dp)))

    nq, nk = N // tq, N // tk
    # TODO(synk): on v7x, pipeline_mode=pl.Buffered(1) on the constant
    # ww/shift specs would reclaim their second pipeline buffer for headroom.

    out = pl.pallas_call(
        nonlocal_attn_kernel,
        out_shape=jax.ShapeDtypeStruct((B, C, N), x_nchw.dtype),
        grid_spec=pltpu.PrefetchScalarGridSpec(
            num_scalar_prefetch=0,
            grid=(B, nq, nk),
            in_specs=[
                pl.BlockSpec((1, Ci_p, tq), lambda b, qi, ki: (b, 0, qi)),  # theta
                pl.BlockSpec((1, tk, Ci_p), lambda b, qi, ki: (b, ki, 0)),  # phi^T
                pl.BlockSpec((1, Ci_p, tk), lambda b, qi, ki: (b, 0, ki)),  # g
                pl.BlockSpec((1, C, tq), lambda b, qi, ki: (b, 0, qi)),     # x (res)
                pl.BlockSpec((C, Ci_p), lambda b, qi, ki: (0, 0)),          # W (+BN)
                pl.BlockSpec((C, 1), lambda b, qi, ki: (0, 0)),             # shift
            ],
            out_specs=pl.BlockSpec((1, C, tq), lambda b, qi, ki: (b, 0, qi)),
            scratch_shapes=[
                pltpu.VMEM((1, tq), jnp.float32),       # running row max
                pltpu.VMEM((1, tq), jnp.float32),       # running row sum
                pltpu.VMEM((Ci_p, tq), jnp.float32),    # un-normalized y accum
            ],
        ),
        compiler_params=pltpu.CompilerParams(
            dimension_semantics=("parallel", "parallel", "arbitrary"),
            vmem_limit_bytes=(vmem_limit_bytes
                              or _vmem_budget_bytes(C, Ci_p, tq, tk)),
        ),
    )(theta_p, phi_p, g_p, x_bcn, ww_fold, shift)

    return out.reshape(B, C, H, W)


def nonlocal_reference(x_nchw, params):
    """Pure-JAX f32 reference mirroring the PyTorch forward (eval-mode BN)."""
    B, C, H, W = x_nchw.shape
    N = H * W
    x_flat = x_nchw.reshape(B, C, N)                                   # (B, C, N)

    def conv1x1(w, b, xf):  # w: (O, I), xf: (B, I, N) -> (B, O, N)
        return jnp.einsum("oi,bin->bon", w, xf) + b[None, :, None]

    g_x = jnp.transpose(conv1x1(params["wg"], params["bg"], x_flat), (0, 2, 1))
    theta_x = jnp.transpose(conv1x1(params["wt"], params["bt"], x_flat), (0, 2, 1))
    phi_x = conv1x1(params["wp"], params["bp"], x_flat)                # (B, Ci, N)
    f = jnp.einsum("bnc,bcm->bnm", theta_x, phi_x)
    f_div = jax.nn.softmax(f, axis=-1)
    y = jnp.einsum("bnm,bmc->bnc", f_div, g_x)                         # (B, N, Ci)
    y = jnp.transpose(y, (0, 2, 1)).reshape(B, -1, H, W)
    w_y = (jnp.einsum("oi,bihw->bohw", params["ww"], y)
           + params["bw"][None, :, None, None])
    eps = 1e-5
    scale = params["bn_gamma"] / jnp.sqrt(params["bn_var"] + eps)
    shift = params["bn_beta"] - params["bn_mean"] * scale
    w_y = w_y * scale[None, :, None, None] + shift[None, :, None, None]
    return w_y + x_nchw


def make_params(key, inplanes):
    inter = inplanes // 2
    ks = jax.random.split(key, 8)
    s = 0.1
    return {
        "wg": s * jax.random.normal(ks[0], (inter, inplanes), jnp.float32),
        "bg": s * jax.random.normal(ks[1], (inter,), jnp.float32),
        "wt": s * jax.random.normal(ks[2], (inter, inplanes), jnp.float32),
        "bt": s * jax.random.normal(ks[3], (inter,), jnp.float32),
        "wp": s * jax.random.normal(ks[4], (inter, inplanes), jnp.float32),
        "bp": s * jax.random.normal(ks[5], (inter,), jnp.float32),
        "ww": s * jax.random.normal(ks[6], (inplanes, inter), jnp.float32),
        "bw": s * jax.random.normal(ks[7], (inplanes,), jnp.float32),
        # BatchNorm2d: nn.init.constant(weight, 1), constant(bias, 0);
        # eval-mode running stats (mean=0, var=1).
        "bn_gamma": jnp.ones((inplanes,), jnp.float32),
        "bn_beta": jnp.zeros((inplanes,), jnp.float32),
        "bn_mean": jnp.zeros((inplanes,), jnp.float32),
        "bn_var": jnp.ones((inplanes,), jnp.float32),
    }


if __name__ == "__main__":
    key = jax.random.PRNGKey(0)
    k_x, k_p, k_x2, k_p2 = jax.random.split(key, 4)

    # Config 1: module-sized test (inplanes=4 -> inter_planes=2, N=256).
    # 128-wide tiles give a 2x2 (q, kv) tile grid so the online-softmax
    # carry and the Ci->8 padding path are both exercised.
    B, C, H, W = 2, 4, 16, 16
    x = jax.random.normal(k_x, (B, C, H, W), jnp.float32)
    params = make_params(k_p, C)
    out = jax.block_until_ready(nonlocal_pallas(x, params, tq=128, tk=128))
    ref = jax.block_until_ready(nonlocal_reference(x, params))
    assert out.shape == (B, C, H, W)
    # bf16 MXU inputs (f32 accumulation) -> relaxed tolerance vs. the f32 ref.
    assert jnp.allclose(out, ref, atol=2e-2, rtol=2e-2), "config1 mismatch"

    # Config 2: wider channels / larger N with the 256-wide default tiles.
    B2, C2, H2, W2 = 1, 16, 16, 32
    x2 = jax.random.normal(k_x2, (B2, C2, H2, W2), jnp.float32)
    params2 = make_params(k_p2, C2)
    out2 = jax.block_until_ready(nonlocal_pallas(x2, params2))
    ref2 = jax.block_until_ready(nonlocal_reference(x2, params2))
    assert jnp.allclose(out2, ref2, atol=2e-2, rtol=2e-2), "config2 mismatch"

    print("KERNEL_OK")
</pallas_src>

<mosaic_0001>
module attributes {stable_mosaic.version = 11 : i64} {
  func.func @nonlocal_attn_kernel(%arg0: i32, %arg1: i32, %arg2: i32, %arg3: memref<1x8x128xbf16, #tpu.memory_space<vmem>>, %arg4: memref<1x128x8xbf16, #tpu.memory_space<vmem>>, %arg5: memref<1x8x128xbf16, #tpu.memory_space<vmem>>, %arg6: memref<1x4x128xf32, #tpu.memory_space<vmem>>, %arg7: memref<4x8xbf16, #tpu.memory_space<vmem>>, %arg8: memref<4x1xf32, #tpu.memory_space<vmem>>, %arg9: memref<1x4x128xf32, #tpu.memory_space<vmem>>, %arg10: memref<1x128xf32, #tpu.memory_space<vmem>>, %arg11: memref<1x128xf32, #tpu.memory_space<vmem>>, %arg12: memref<8x128xf32, #tpu.memory_space<vmem>>) attributes {dimension_semantics = [#tpu.dimension_semantics<parallel>, #tpu.dimension_semantics<parallel>, #tpu.dimension_semantics<arbitrary>], iteration_bounds = array<i64: 2, 2, 2>, scalar_prefetch = 0 : i64, scratch_operands = 3 : i64, tpu.core_type = #tpu.core_type<tc>, window_params = [{transform_indices = @transform_0, window_bounds = array<i64: 1, 8, 128>}, {transform_indices = @transform_1, window_bounds = array<i64: 1, 128, 8>}, {transform_indices = @transform_2, window_bounds = array<i64: 1, 8, 128>}, {transform_indices = @transform_3, window_bounds = array<i64: 1, 4, 128>}, {pipeline_mode = #tpu.pipeline_mode<synchronous>, transform_indices = @transform_4, window_bounds = array<i64: 4, 8>}, {pipeline_mode = #tpu.pipeline_mode<synchronous>, transform_indices = @transform_5, window_bounds = array<i64: 4, 1>}, {transform_indices = @transform_6, window_bounds = array<i64: 1, 4, 128>}]} {
    %c0_i32 = arith.constant 0 : i32
    %0 = arith.cmpi eq, %arg2, %c0_i32 : i32
    %1 = arith.extui %0 : i1 to i32
    %c0_i32_0 = arith.constant 0 : i32
    %2 = arith.cmpi ne, %1, %c0_i32_0 : i32
    scf.if %2 {
      %cst_25 = arith.constant 0xFF800000 : f32
      %36 = vector.broadcast %cst_25 : f32 to vector<1x128xf32>
      %c0_26 = arith.constant 0 : index
      %c0_27 = arith.constant 0 : index
      %37 = vector.load %arg10[%c0_26, %c0_27] : memref<1x128xf32, #tpu.memory_space<vmem>>, vector<1x128xf32>
      tpu.vector_store %arg10[%c0_26, %c0_27], %36 {strides = array<i32>} : memref<1x128xf32, #tpu.memory_space<vmem>>, vector<1x128xf32>,
      %cst_28 = arith.constant 0.000000e+00 : f32
      %38 = vector.broadcast %cst_28 : f32 to vector<1x128xf32>
      %c0_29 = arith.constant 0 : index
      %c0_30 = arith.constant 0 : index
      %39 = vector.load %arg11[%c0_29, %c0_30] : memref<1x128xf32, #tpu.memory_space<vmem>>, vector<1x128xf32>
      tpu.vector_store %arg11[%c0_29, %c0_30], %38 {strides = array<i32>} : memref<1x128xf32, #tpu.memory_space<vmem>>, vector<1x128xf32>,
      %cst_31 = arith.constant 0.000000e+00 : f32
      %40 = vector.broadcast %cst_31 : f32 to vector<8x128xf32>
      %c0_32 = arith.constant 0 : index
      %c0_33 = arith.constant 0 : index
      %41 = vector.load %arg12[%c0_32, %c0_33] : memref<8x128xf32, #tpu.memory_space<vmem>>, vector<8x128xf32>
      tpu.vector_store %arg12[%c0_32, %c0_33], %40 {strides = array<i32>} : memref<8x128xf32, #tpu.memory_space<vmem>>, vector<8x128xf32>,
    } else {
    }
    %c0 = arith.constant 0 : index
    %c0_1 = arith.constant 0 : index
    %c0_2 = arith.constant 0 : index
    %3 = vector.load %arg4[%c0, %c0_1, %c0_2] : memref<1x128x8xbf16, #tpu.memory_space<vmem>>, vector<1x128x8xbf16>
    %4 = vector.shape_cast %3 : vector<1x128x8xbf16> to vector<128x8xbf16>
    %c0_3 = arith.constant 0 : index
    %c0_4 = arith.constant 0 : index
    %c0_5 = arith.constant 0 : index
    %5 = vector.load %arg3[%c0_3, %c0_4, %c0_5] : memref<1x8x128xbf16, #tpu.memory_space<vmem>>, vector<1x8x128xbf16>
    %6 = vector.shape_cast %5 : vector<1x8x128xbf16> to vector<8x128xbf16>
    %cst = arith.constant dense<0.000000e+00> : vector<128x128xf32>
    %7 = tpu.matmul %4, %6, %cst {dimension_numbers = #tpu.dot_dimension_numbers<[1], [0], [0], [1], [0, 0, 1, 1], [], []>} : vector<128x8xbf16>, vector<8x128xbf16>, vector<128x128xf32> -> vector<128x128xf32>
    %c0_6 = arith.constant 0 : index
    %c0_7 = arith.constant 0 : index
    %8 = vector.load %arg10[%c0_6, %c0_7] : memref<1x128xf32, #tpu.memory_space<vmem>>, vector<1x128xf32>
    %cst_8 = arith.constant dense<0xFF800000> : vector<128xf32>
    %9 = vector.multi_reduction <maximumf>, %7, %cst_8 [0] : vector<128x128xf32> to vector<128xf32>
    %10 = vector.shape_cast %9 : vector<128xf32> to vector<1x128xf32>
    %11 = arith.maximumf %8, %10 : vector<1x128xf32>
    %12 = arith.subf %8, %11 : vector<1x128xf32>
    %13 = math.exp %12 : vector<1x128xf32>
    %14 = vector.broadcast %11 : vector<1x128xf32> to vector<128x128xf32>
    %15 = arith.subf %7, %14 : vector<128x128xf32>
    %16 = math.exp %15 : vector<128x128xf32>
    %c0_9 = arith.constant 0 : index
    %c0_10 = arith.constant 0 : index
    %17 = vector.load %arg11[%c0_9, %c0_10] : memref<1x128xf32, #tpu.memory_space<vmem>>, vector<1x128xf32>
    %18 = arith.mulf %13, %17 : vector<1x128xf32>
    %cst_11 = arith.constant dense<0.000000e+00> : vector<128xf32>
    %19 = vector.multi_reduction <add>, %16, %cst_11 [0] : vector<128x128xf32> to vector<128xf32>
    %20 = vector.shape_cast %19 : vector<128xf32> to vector<1x128xf32>
    %21 = arith.addf %18, %20 : vector<1x128xf32>
    %c0_12 = arith.constant 0 : index
    %c0_13 = arith.constant 0 : index
    %22 = vector.load %arg11[%c0_12, %c0_13] : memref<1x128xf32, #tpu.memory_space<vmem>>, vector<1x128xf32>
    tpu.vector_store %arg11[%c0_12, %c0_13], %21 {strides = array<i32>} : memref<1x128xf32, #tpu.memory_space<vmem>>, vector<1x128xf32>,
    %c0_14 = arith.constant 0 : index
    %c0_15 = arith.constant 0 : index
    %23 = vector.load %arg12[%c0_14, %c0_15] : memref<8x128xf32, #tpu.memory_space<vmem>>, vector<8x128xf32>
    %24 = vector.broadcast %13 : vector<1x128xf32> to vector<8x128xf32>
    %25 = arith.mulf %24, %23 : vector<8x128xf32>
    %c0_16 = arith.constant 0 : index
    %c0_17 = arith.constant 0 : index
    %c0_18 = arith.constant 0 : index
    %26 = vector.load %arg5[%c0_16, %c0_17, %c0_18] : memref<1x8x128xbf16, #tpu.memory_space<vmem>>, vector<1x8x128xbf16>
    %27 = vector.shape_cast %26 : vector<1x8x128xbf16> to vector<8x128xbf16>
    %28 = arith.truncf %16 : vector<128x128xf32> to vector<128x128xbf16>
    %cst_19 = arith.constant dense<0.000000e+00> : vector<8x128xf32>
    %29 = tpu.matmul %27, %28, %cst_19 {dimension_numbers = #tpu.dot_dimension_numbers<[1], [0], [0], [1], [0, 0, 1, 1], [], []>} : vector<8x128xbf16>, vector<128x128xbf16>, vector<8x128xf32> -> vector<8x128xf32>
    %30 = arith.addf %25, %29 : vector<8x128xf32>
    %c0_20 = arith.constant 0 : index
    %c0_21 = arith.constant 0 : index
    %31 = vector.load %arg12[%c0_20, %c0_21] : memref<8x128xf32, #tpu.memory_space<vmem>>, vector<8x128xf32>
    tpu.vector_store %arg12[%c0_20, %c0_21], %30 {strides = array<i32>} : memref<8x128xf32, #tpu.memory_space<vmem>>, vector<8x128xf32>,
    %c0_22 = arith.constant 0 : index
    %c0_23 = arith.constant 0 : index
    %32 = vector.load %arg10[%c0_22, %c0_23] : memref<1x128xf32, #tpu.memory_space<vmem>>, vector<1x128xf32>
    tpu.vector_store %arg10[%c0_22, %c0_23], %11 {strides = array<i32>} : memref<1x128xf32, #tpu.memory_space<vmem>>, vector<1x128xf32>,
    %c1_i32 = arith.constant 1 : i32
    %33 = arith.cmpi eq, %arg2, %c1_i32 : i32
    %34 = arith.extui %33 : i1 to i32
    %c0_i32_24 = arith.constant 0 : i32
    %35 = arith.cmpi ne, %34, %c0_i32_24 : i32
    scf.if %35 {
      %c0_25 = arith.constant 0 : index
      %c0_26 = arith.constant 0 : index
      %36 = vector.load %arg11[%c0_25, %c0_26] : memref<1x128xf32, #tpu.memory_space<vmem>>, vector<1x128xf32>
      %37 = tpu.reciprocal %36 {approx = true} : vector<1x128xf32> -> vector<1x128xf32>
      %c0_27 = arith.constant 0 : index
      %c0_28 = arith.constant 0 : index
      %38 = vector.load %arg12[%c0_27, %c0_28] : memref<8x128xf32, #tpu.memory_space<vmem>>, vector<8x128xf32>
      %39 = vector.broadcast %37 : vector<1x128xf32> to vector<8x128xf32>
      %40 = arith.mulf %38, %39 : vector<8x128xf32>
      %41 = arith.truncf %40 : vector<8x128xf32> to vector<8x128xbf16>
      %c0_29 = arith.constant 0 : index
      %c0_30 = arith.constant 0 : index
      %42 = vector.load %arg7[%c0_29, %c0_30] : memref<4x8xbf16, #tpu.memory_space<vmem>>, vector<4x8xbf16>
      %cst_31 = arith.constant dense<0.000000e+00> : vector<4x128xf32>
      %43 = tpu.matmul %42, %41, %cst_31 {dimension_numbers = #tpu.dot_dimension_numbers<[1], [0], [0], [1], [0, 0, 1, 1], [], []>} : vector<4x8xbf16>, vector<8x128xbf16>, vector<4x128xf32> -> vector<4x128xf32>
      %c0_32 = arith.constant 0 : index
      %c0_33 = arith.constant 0 : index
      %44 = vector.load %arg8[%c0_32, %c0_33] : memref<4x1xf32, #tpu.memory_space<vmem>>, vector<4x1xf32>
      %45 = vector.broadcast %44 : vector<4x1xf32> to vector<4x128xf32>
      %46 = arith.addf %43, %45 : vector<4x128xf32>
      %c0_34 = arith.constant 0 : index
      %c0_35 = arith.constant 0 : index
      %c0_36 = arith.constant 0 : index
      %47 = vector.load %arg6[%c0_34, %c0_35, %c0_36] : memref<1x4x128xf32, #tpu.memory_space<vmem>>, vector<1x4x128xf32>
      %48 = vector.shape_cast %47 : vector<1x4x128xf32> to vector<4x128xf32>
      %49 = arith.addf %46, %48 : vector<4x128xf32>
      %c0_37 = arith.constant 0 : index
      %c0_38 = arith.constant 0 : index
      %c0_39 = arith.constant 0 : index
      %50 = vector.load %arg9[%c0_37, %c0_38, %c0_39] : memref<1x4x128xf32, #tpu.memory_space<vmem>>, vector<1x4x128xf32>
      %51 = vector.shape_cast %50 : vector<1x4x128xf32> to vector<4x128xf32>
      %52 = vector.shape_cast %49 : vector<4x128xf32> to vector<1x4x128xf32>
      tpu.vector_store %arg9[%c0_37, %c0_38, %c0_39], %52 {strides = array<i32>} : memref<1x4x128xf32, #tpu.memory_space<vmem>>, vector<1x4x128xf32>,
    } else {
    }
    return
  }
  func.func @transform_0(%arg0: i32, %arg1: i32, %arg2: i32) -> (i32, i32, i32) {
    %c0_i32 = arith.constant 0 : i32
    %c0_i32_0 = arith.constant 0 : i32
    return %arg0, %c0_i32, %arg1 : i32, i32, i32
  }
  func.func @transform_1(%arg0: i32, %arg1: i32, %arg2: i32) -> (i32, i32, i32) {
    %c0_i32 = arith.constant 0 : i32
    %c0_i32_0 = arith.constant 0 : i32
    return %arg0, %arg2, %c0_i32 : i32, i32, i32
  }
  func.func @transform_2(%arg0: i32, %arg1: i32, %arg2: i32) -> (i32, i32, i32) {
    %c0_i32 = arith.constant 0 : i32
    %c0_i32_0 = arith.constant 0 : i32
    return %arg0, %c0_i32, %arg2 : i32, i32, i32
  }
  func.func @transform_3(%arg0: i32, %arg1: i32, %arg2: i32) -> (i32, i32, i32) {
    %c0_i32 = arith.constant 0 : i32
    %c0_i32_0 = arith.constant 0 : i32
    return %arg0, %c0_i32, %arg1 : i32, i32, i32
  }
  func.func @transform_4(%arg0: i32, %arg1: i32, %arg2: i32) -> (i32, i32) {
    %c0_i32 = arith.constant 0 : i32
    %c0_i32_0 = arith.constant 0 : i32
    %c0_i32_1 = arith.constant 0 : i32
    return %c0_i32, %c0_i32_0 : i32, i32
  }
  func.func @transform_5(%arg0: i32, %arg1: i32, %arg2: i32) -> (i32, i32) {
    %c0_i32 = arith.constant 0 : i32
    %c0_i32_0 = arith.constant 0 : i32
    %c0_i32_1 = arith.constant 0 : i32
    return %c0_i32, %c0_i32_0 : i32, i32
  }
  func.func @transform_6(%arg0: i32, %arg1: i32, %arg2: i32) -> (i32, i32, i32) {
    %c0_i32 = arith.constant 0 : i32
    %c0_i32_0 = arith.constant 0 : i32
    return %arg0, %c0_i32, %arg1 : i32, i32, i32
  }
}

</mosaic_0001>

<bundles_post_ra>
// kernel: tpu_custom_call.1
= control target key start
LH: loop header
LB: loop body
LE: loop exit
PB: predicated region body
PF: predicated region fallthrough
CT: control target
= control target key end

     0   :  { %s1629_s0 = inlined_call_operand.vmem [shape: bf16[2,8,256], index: 0, kind: input, shape index: {}]   ;;  %s1630_s1 = inlined_call_operand.vmem [shape: bf16[2,256,8], index: 1, kind: input, shape index: {}]   ;;  %s1631_s2 = inlined_call_operand.vmem [shape: bf16[2,8,256], index: 2, kind: input, shape index: {}]   ;;  %s1632_s3 = inlined_call_operand.vmem [shape: f32[2,4,256], index: 3, kind: input, shape index: {}]   ;;  %s1633_s4 = inlined_call_operand.vmem [shape: bf16[4,8], index: 4, kind: input, shape index: {}]   ;;  %s1634_s5 = inlined_call_operand.vmem [shape: f32[4,1], index: 5, kind: input, shape index: {}]   ;;  %s1635_s6 = inlined_call_operand.hbm [shape: f32[2,4,256], index: 6, kind: output, shape index: {}]  }
   0x1   :  { %1650 = sst [smem:[#allocation20_spill]] %s1635_s6 }
   0x2   :  { %11 = vsyncpa [#allocation6], 0 }
   0x3   :  { %13 = vsyncpa [#allocation6 + $0x1], 0  ;;  %s1357_s21 = smov 0   ;;  %s1359_s22 = smov 0  }
   0x4   :  { %s1361_s23 = smov 0   ;;  %s1363_s24 = smov 0  }
   0x5   :  { %s1365_s25 = smov 0   ;;  %s1367_s26 = smov 0  }
   0x6   :  { %s1369_s27 = smov 0   ;;  %s1371_s28 = smov 0  }
   0x7   :  { %s1373_s29 = smov 0   ;;  %s1375_s30 = smov 0  }
   0x8 LB: > { %1651 = sst [smem:[#allocation8_spill]] %s1276_s21  ;;  %s961_s7 = sadd.s32 4294967295, %s1312_s30   ;;  %s1312_s30 = sphi %s1375_s30, %s19_s30   ;;  %s1308_s29 = sphi %s1373_s29, %s1678_s29   ;;  %s1304_s28 = sphi %s1371_s28, %s1677_s28   ;;  %s1300_s27 = sphi %s1369_s27, %s1676_s27   ;;  %s1296_s26 = sphi %s1367_s26, %s1675_s26   ;;  %s1292_s25 = sphi %s1365_s25, %s1674_s25   ;;  %s1288_s24 = sphi %s1363_s24, %s1673_s24   ;;  %s1284_s23 = sphi %s1361_s23, %s1672_s23   ;;  %s1280_s22 = sphi %s1359_s22, %s1680_s22   ;;  %s1276_s21 = sphi %s1357_s21, %s1679_s21  }
   0x9   : > { %1652 = sst [smem:[#allocation9_spill]] %s1284_s23  ;;  %s962_s8 = sadd.s32 4294967294, %s1312_s30  }
   0xa   : > { %1653 = sst [smem:[#allocation10_spill]] %s1300_s27  ;;  %s31_s9 = sadd.s32 1, %s1300_s27 }
   0xb   : > { %1654 = sst [smem:[#allocation11_spill]] %s1304_s28  ;;  %p32_p0 = scmp.ge.s32.totalorder %s31_s9, 2 }
   0xc   : > { %1655 = sst [smem:[#allocation12_spill]] %s1308_s29  ;;  %s34_s10 = sadd.s32 1, %s1304_s28 }
   0xd   : > { %1656 = sst [smem:[#allocation13_spill]] %s1312_s30  ;;  %s38_s11 = sadd.s32 1, %s1308_s29 }
   0xe   : > { %p211_p1 = scmp.ne.s32.totalorder %s1284_s23, %s1280_s22  ;;  %s1682_s9 = smov (%p32_p0, %s31_s9), 0 }
   0xf   : > { %1657 = sst [smem:[#allocation14_spill]] %s1682_s9  ;;  %s1684_s10 = smov (!%p32_p0, %s34_s10), %s1304_s28 }
  0x10   : > { %p212_p2 = scmp.eq.s32.totalorder %s961_s7, 7  ;;  %p217_p3 = scmp.ne.s32.totalorder %s1280_s22, %s1276_s21 }
  0x11   : > { %p36_p4 = scmp.ge.s32.totalorder %s1684_s10, 2  ;;  %p218_p5 = scmp.eq.s32.totalorder %s962_s8, 7 }
  0x12   : > { %p1419_p6 = por %p212_p2, %p211_p1  ;;  %p965_p8 = scmp.ge.s32.totalorder %s1312_s30, 1 }
  0x13   : > { %s1686_s10 = smov (%p36_p4, %s1684_s10), 0  ;;  %s1688_s11 = smov (!%p36_p4, %s38_s11), %s1308_s29 }
  0x14   : > { %s1658_s12 = scalar_select %p1419_p6, 1, 0 }
  0x15   : > { %1660 = sst [smem:[#allocation16_spill]] %s1686_s10  ;;  %p1426_p7 = por %p218_p5, %p217_p3 }
  0x16   : > { %1659 = sst [smem:[#allocation15_spill]] %s1658_s12  ;;  %p40_p9 = scmp.ge.s32.totalorder %s1688_s11, 2 }
  0x17   : > { %s1661_s13 = scalar_select %p1426_p7, 1, 0 }
  0x18   : > { %p288_p10 = scmp.lt.s32.totalorder %s1312_s30, 9  ;;  %s197_s14 = ssub.s32 %s1304_s28, %s1686_s10 }
  0x19   : > { %1662 = sst [smem:[#allocation17_spill]] %s1661_s13  ;;  %s1690_s11 = smov (%p40_p9, %s1688_s11), 0 }
  0x1a   : > { %1663 = sst [smem:[#allocation18_spill]] %s1690_s11  ;;  %p289_p11 = pnand %p965_p8, %p288_p10 }
  0x1b   : > { %s196_s15 = ssub.s32 %s1308_s29, %s1690_s11  ;;  %s201_s17 = sadd.s32 1, %s1284_s23 }
  0x1c   : > { %s198_s16 = sor.u32 %s197_s14, %s196_s15  ;;  %s1641_s19 = sand.u32 (!%p289_p11), 1, %s1280_s22  }
  0x1d   : > { %p199_p12 = scmp.eq.s32.totalorder %s198_s16, 0  ;;  %292 = sbr.rel (%p289_p11) target bundleno = 815 (0x32f), region = 44 }
  0x1e   : > { %p346_p13 = scmp.lt.s32.totalorder (!%p289_p11), %s1296_s26, 1  ;;  %s1446_s20 = sshll.u32 (!%p289_p11), %s1641_s19, 2 }
  0x1f   : > { %s1440_s18 = scalar_select %p199_p12, %s1284_s23, %s201_s17  }
  0x20   : > { %p348_p0 = scmp.lt.s32.totalorder (!%p289_p11), %s1292_s25, 1  ;;  %s969_s7 = sshll.u32 (!%p289_p11), %s1288_s24, 4 }
  0x21   : > { %1664 = sst [smem:[#allocation19_spill]] %s1440_s18  ;;  %p357_p1 = scmp.lt.s32.totalorder (!%p289_p11), %s969_s7, 31 }
  0x22   : > { %s347_s8 = scalar_select %p346_p13, %s1296_s26, 1 }
  0x23   : > { %s349_s14 = scalar_select %p348_p0, %s1292_s25, 1 }
  0x24   : > { %s967_s15 = sshll.u32 %s347_s8, 1  ;;  %s970_s17 = sshll.u32 %s347_s8, 5 }
  0x25   : > { %s351_s16 = sadd.s32 %s967_s15, %s349_s14  ;;  %p366_p2 = scmp.lt.s32.totalorder %s1288_s24, 1 }
  0x26   : > { %s968_s11 = sshll.u32 %s351_s16, 2  ;;  %s1692_s7 = smov (!%p357_p1, %s969_s7), 31 }
  0x27   : > { %s353_s29 = scalar_lea.vmem %s1629_s0, %s968_s11  ;;  %s1459_s19 = scalar_lea.vmem %s1632_s3, %s968_s11 }
  0x28   : > { %s367_s18 = scalar_select %p366_p2, %s1288_s24, 1 }
  0x29   : > { %s360_s23 = sadd.s32 %s970_s17, %s1692_s7  ;;  %s345_s10 = scalar_lea.vmem [#allocation5], %s1446_s20 }
  0x2a   : > { %s971_s13 = sshll.u32 %s360_s23, 2  ;;  %s369_s21 = sadd.s32 %s967_s15, %s367_s18 }
  0x2b   : > { %s1465_s8 = scalar_lea.vmem %s1630_s1, %s971_s13  ;;  %s973_s14 = sshll.u32 %s369_s21, 2 }
  0x2c   : > { %s1470_s9 = scalar_lea.vmem %s1631_s2, %s973_s14  ;;  %p976_p3 = scmp.ne.s32.totalorder %s1288_s24, 0 }
  0x2e   : > { %384 = sbr.rel (%p976_p3) target bundleno = 54 (0x36), region = 48 }
  0x33   : > { %v1314_v0 = vmov -inf   ;;  %v1315_v1 = vmov 0.0  }
  0x34   : > { %385 = vst [vmem:[#allocation2] sm:$0x1] %v1314_v0  ;;  %386 = vst [vmem:[#allocation3] sm:$0x1] %v1315_v1 }
  0x35   : > { %387 = vst [vmem:[#allocation4] sm:$0xff] %v1315_v1 }
  0x36 PF: > { %v404_v2 = vld [vmem:[%s353_s29] sm:$0xf]  ;;  %vm470_vm0 = vcmask 1043456   ;;  %vm445_vm1 = vcmask 64512   ;;  %v1160_v5 = vld [vmem:[%s1465_s8 + $0x8] sm:$0xff]   ;;  %v1161_v6 = vld [vmem:[%s1465_s8 + $0x10] sm:$0xff]   ;;  %v598_v46 = vlaneseq }
  0x37   : > { %v1159_v3 = vld [vmem:[%s1465_s8] sm:$0xff]   ;;  %1064 = vmatprep.subr.msk.bf16.mxu0 %vm470_vm0, %v404_v2  ;;  %v472_v4 = vsel %vm470_vm0, %v404_v2, 0  ;;  %v1162_v7 = vld [vmem:[%s1465_s8 + $0x18] sm:$0xff]   ;;  %v1164_v9 = vld [vmem:[%s1465_s8 + $0x28] sm:$0xff]   ;;  %v1316_v12 = vmov 0.0   ;;  %vm1317_vm2 = vmmov 0  }
  0x38   : > { %1021 = vmatpush3.bf16.msra.mxu0 %v472_v4  ;;  %1022 = vmatprep.mubr.msk.bf16.mxu0 %vm445_vm1, %v1159_v3  ;;  %v1163_v8 = vld [vmem:[%s1465_s8 + $0x20] sm:$0xff]   ;;  %v1165_v10 = vld [vmem:[%s1465_s8 + $0x30] sm:$0xff]   ;;  %v1166_v11 = vld [vmem:[%s1465_s8 + $0x38] sm:$0xff]   ;;  %v599_v49 = vshrl.u32 %v598_v46, 7  ;;  %p993_p4 = scmp.ne.s32.totalorder %s1288_s24, 1 }
  0x39   : > { %1038 = vmatprep.subr.bf16.mxu1 %v1316_v12  ;;  %1054 = vmatprep.mubr.msk.bf16.mxu1 %vm1317_vm2, %v1316_v12 }
  0x3a   : > { %v1524_v53 = vsub.s32 0, %v599_v49 }
  0x3b   : > { %1023 = vmatmul.mubr.msk.bf16.vlgmr.msra.gmra.mxu0 %vm445_vm1, %v1160_v5  ;;  %v571_v51 = vld [vmem:[#allocation2] sm:$0x1] }
  0x3c   : > { %1026 = vmatprep.mubr.msk.bf16.mxu0 %vm445_vm1, %v1161_v6 }
  0x43   : > { %1027 = vmatmul.mubr.msk.bf16.gmra.mxu0 %vm445_vm1, %v1162_v7 }
  0x44   : > { %1030 = vmatprep.mubr.msk.bf16.mxu0 %vm445_vm1, %v1163_v8 }
  0x4b   : > { %1031 = vmatmul.mubr.msk.bf16.gmra.mxu0 %vm445_vm1, %v1164_v9 }
  0x4c   : > { %1034 = vmatprep.mubr.msk.bf16.mxu0 %vm445_vm1, %v1165_v10 }
  0x53   : > { %1035 = vmatmul.mubr.msk.bf16.gmra.mxu0 %vm445_vm1, %v1166_v11 }
  0xfb   : > { %v1024_v13 = vpop.f32.mrf.mxu0 }
  0xfd   : > { %v508_v14 = vpop.f32.mrf.mxu0 }
  0xff   : > { %v1025_v15 = vpop.f32.mrf.mxu0 }
 0x101   : > { %v511_v16 = vpop.f32.mrf.mxu0 }
 0x103   : > { %v1494_v17 = vpop.f32.mrf.mxu0 }
 0x104   : > { %v574_v28 = vmax.f32 %v1024_v13, %v1494_v17 }
 0x105   : > { %v524_v18 = vpop.f32.mrf.mxu0 }
 0x106   : > { %v572_v29 = vmax.f32 %v508_v14, %v524_v18 }
 0x107   : > { %v1496_v19 = vpop.f32.mrf.mxu0 }
 0x108   : > { %v575_v26 = vmax.f32 %v1025_v15, %v1496_v19 }
 0x109   : > { %v527_v20 = vpop.f32.mrf.mxu0 }
 0x10a   : > { %v573_v30 = vmax.f32 %v511_v16, %v527_v20 }
 0x10b   : > { %v1498_v21 = vpop.f32.mrf.mxu0 }
 0x10c   : > { %v578_v33 = vmax.f32 %v574_v28, %v1498_v21 }
 0x10d   : > { %v1500_v22 = vpop.f32.mrf.mxu0 }
 0x10e   : > { %v576_v34 = vmax.f32 %v572_v29, %v1500_v22 }
 0x10f   : > { %v1502_v23 = vpop.f32.mrf.mxu0 }
 0x110   : > { %v579_v31 = vmax.f32 %v575_v26, %v1502_v23 }
 0x111   : > { %v1504_v24 = vpop.f32.mrf.mxu0 }
 0x112   : > { %v577_v35 = vmax.f32 %v573_v30, %v1504_v24 }
 0x113   : > { %v1506_v25 = vpop.f32.mrf.mxu0 }
 0x114   : > { %v582_v38 = vmax.f32 %v578_v33, %v1506_v25 }
 0x115   : > { %v1509_v27 = vpop.f32.mrf.mxu0 }
 0x116   : > { %v580_v39 = vmax.f32 %v576_v34, %v1509_v27 }
 0x117   : > { %v1513_v32 = vpop.f32.mrf.mxu0 }
 0x118   : > { %v583_v36 = vmax.f32 %v579_v31, %v1513_v32 }
 0x119   : > { %v1519_v37 = vpop.f32.mrf.mxu0 }
 0x11a   : > { %v581_v40 = vmax.f32 %v577_v35, %v1519_v37  ;;  %v585_v41 = vmax.f32 %v582_v38, %v583_v36 }
 0x11c   : > { %v584_v42 = vmax.f32 %v580_v39, %v581_v40 }
 0x11e   : > { %v586_v43 = vmax.f32 %v584_v42, %v585_v41 }
 0x120   : > { %v587_v44 = vrot.slane %v586_v43, 4 }
 0x122   : > { %v588_v45 = vmax.f32 %v586_v43, %v587_v44 }
 0x124   : > { %v589_v47 = vrot.slane %v588_v45, 2 }
 0x126   : > { %v590_v48 = vmax.f32 %v588_v45, %v589_v47 }
 0x128   : > { %v591_v50 = vrot.slane %v590_v48, 1 }
 0x12a   : > { %v592_v52 = vmax.f32 %v590_v48, %v591_v50 }
 0x12c   : > { %v593_v54 = vmax.f32 %v571_v51, %v592_v52 }
 0x12e   : > { %v594_v55 = vsub.f32 %v571_v51, %v593_v54  ;;  %v601_v56 = vrot.slane %v593_v54, %v1524_v53  ;;  %735 = vst [vmem:[#allocation2] sm:$0x1] %v593_v54 }
 0x130   : > { %v595_v57 = vmul.f32 1.442695, %v594_v55  ;;  %v603_v58 = vsub.f32 %v508_v14, %v601_v56  ;;  %v604_v59 = vsub.f32 %v511_v16, %v601_v56  ;;  %v605_v60 = vsub.f32 %v1024_v13, %v601_v56 }
 0x131   : > { %v606_v61 = vsub.f32 %v1025_v15, %v601_v56  ;;  %v607_v0 = vsub.f32 %v524_v18, %v601_v56  ;;  %v608_v2 = vsub.f32 %v527_v20, %v601_v56  ;;  %v609_v4 = vsub.f32 %v1494_v17, %v601_v56 }
 0x132   : > { %1167 = vpow2.f32 %v595_v57  ;;  %v619_v62 = vmul.f32 1.442695, %v603_v58  ;;  %v621_v63 = vmul.f32 1.442695, %v604_v59  ;;  %v623_v1 = vmul.f32 1.442695, %v605_v60 }
 0x133   : > { %v625_v3 = vmul.f32 1.442695, %v606_v61  ;;  %v610_v5 = vsub.f32 %v1496_v19, %v601_v56  ;;  %v627_v6 = vmul.f32 1.442695, %v607_v0  ;;  %v611_v7 = vsub.f32 %v1500_v22, %v601_v56 }
 0x134   : > { %1169 = vpow2.f32 %v619_v62  ;;  %v612_v8 = vsub.f32 %v1504_v24, %v601_v56  ;;  %v629_v9 = vmul.f32 1.442695, %v608_v2  ;;  %v631_v10 = vmul.f32 1.442695, %v609_v4 }
 0x135   : > { %1171 = vpow2.f32 %v621_v63  ;;  %v617_v11 = vsub.f32 %v1506_v25, %v601_v56  ;;  %v633_v13 = vmul.f32 1.442695, %v610_v5  ;;  %v618_v14 = vsub.f32 %v1513_v32, %v601_v56 }
 0x136   : > { %1173 = vpow2.f32 %v623_v1  ;;  %v615_v15 = vsub.f32 %v1509_v27, %v601_v56  ;;  %v635_v16 = vmul.f32 1.442695, %v611_v7  ;;  %v616_v18 = vsub.f32 %v1519_v37, %v601_v56  ;;  %v651_v7 = vld [vmem:[#allocation3] sm:$0x1] }
 0x137   : > { %1175 = vpow2.f32 %v625_v3  ;;  %v637_v19 = vmul.f32 1.442695, %v612_v8  ;;  %v647_v20 = vmul.f32 1.442695, %v617_v11  ;;  %v613_v24 = vsub.f32 %v1498_v21, %v601_v56 }
 0x138   : > { %1177 = vpow2.f32 %v627_v6  ;;  %v649_v25 = vmul.f32 1.442695, %v618_v14  ;;  %v643_v26 = vmul.f32 1.442695, %v615_v15  ;;  %v614_v27 = vsub.f32 %v1502_v23, %v601_v56  ;;  %v684_v15 = vld [vmem:[%s1470_s9] sm:$0xf] }
 0x139   : > { %1179 = vpow2.f32 %v629_v9  ;;  %v645_v29 = vmul.f32 1.442695, %v616_v18  ;;  %v639_v31 = vmul.f32 1.442695, %v613_v24 }
 0x13a   : > { %1181 = vpow2.f32 %v631_v10  ;;  %v641_v21 = vmul.f32 1.442695, %v614_v27 }
 0x13b   : > { %1183 = vpow2.f32 %v633_v13 }
 0x13c   : > { %1185 = vpow2.f32 %v635_v16  ;;  %v676_v16 = vld [vmem:[#allocation4] sm:$0xff] }
 0x13d   : > { %1187 = vpow2.f32 %v637_v19 }
 0x13e   : > { %1189 = vpow2.f32 %v647_v20 }
 0x13f   : > { %v1534_v17 = vpop.eup %1167  ;;  %1191 = vpow2.f32 %v649_v25 }
 0x140   : > { %v681_v22 = vrot.slane %v1534_v17, %v1524_v53  ;;  %1193 = vpow2.f32 %v643_v26  ;;  %v652_v10 = vmul.f32 %v1534_v17, %v651_v7 }
 0x141   : > { %v1540_v28 = vpop.eup %1169  ;;  %1195 = vpow2.f32 %v645_v29 }
 0x142   : > { %v1543_v30 = vpop.eup %1171  ;;  %1197 = vpow2.f32 %v639_v31  ;;  %v683_v18 = vmul.f32 %v681_v22, %v676_v16 }
 0x143   : > { %v653_v32 = vadd.f32 %v1543_v30, %v1540_v28  ;;  %v1174_v33 = vpop.eup %1173  ;;  %1199 = vpow2.f32 %v641_v21  ;;  %v685_v14 = vpack.c.bf16 %v1543_v30, %v1540_v28 }
 0x144   : > { %v1176_v35 = vpop.eup %1175 }
 0x145   : > { %v654_v34 = vadd.f32 %v1174_v33, %v653_v32  ;;  %v1178_v37 = vpop.eup %1177  ;;  %v686_v9 = vpack.c.bf16 %v1176_v35, %v1174_v33 }
 0x146   : > { %v1180_v38 = vpop.eup %1179 }
 0x147   : > { %v655_v36 = vadd.f32 %v1176_v35, %v654_v34  ;;  %v1182_v39 = vpop.eup %1181  ;;  %v687_v5 = vpack.c.bf16 %v1180_v38, %v1178_v37 }
 0x148   : > { %v1184_v41 = vpop.eup %1183 }
 0x149   : > { %v656_v23 = vadd.f32 %v1178_v37, %v655_v36  ;;  %v1186_v42 = vpop.eup %1185  ;;  %v688_v2 = vpack.c.bf16 %v1184_v41, %v1182_v39 }
 0x14a   : > { %v1188_v44 = vpop.eup %1187 }
 0x14b   : > { %v657_v40 = vadd.f32 %v1180_v38, %v656_v23  ;;  %v1190_v45 = vpop.eup %1189  ;;  %v689_v63 = vpack.c.bf16 %v1188_v44, %v1186_v42 }
 0x14c   : > { %v1192_v47 = vpop.eup %1191 }
 0x14d   : > { %v658_v43 = vadd.f32 %v1182_v39, %v657_v40  ;;  %v1194_v48 = vpop.eup %1193  ;;  %v692_v50 = vpack.c.bf16 %v1192_v47, %v1190_v45 }
 0x14e   : > { %v1196_v51 = vpop.eup %1195 }
 0x14f   : > { %v659_v46 = vadd.f32 %v1184_v41, %v658_v43  ;;  %1039 = vmatpush3.bf16.msra.mxu1 %v692_v50  ;;  %v1198_v54 = vpop.eup %1197  ;;  %v691_v56 = vpack.c.bf16 %v1196_v51, %v1194_v48 }
 0x150   : > { %1040 = vmatprep.subr.bf16.mxu1 %v1316_v12  ;;  %v1200_v57 = vpop.eup %1199 }
 0x151   : > { %v660_v49 = vadd.f32 %v1186_v42, %v659_v46  ;;  %v690_v60 = vpack.c.bf16 %v1200_v57, %v1198_v54 }
 0x153   : > { %v661_v52 = vadd.f32 %v1188_v44, %v660_v49  ;;  %1041 = vmatpush3.bf16.msra.mxu1 %v691_v56 }
 0x154   : > { %1042 = vmatprep.subr.bf16.mxu1 %v1316_v12 }
 0x155   : > { %v662_v55 = vadd.f32 %v1198_v54, %v661_v52 }
 0x157   : > { %v663_v58 = vadd.f32 %v1200_v57, %v662_v55  ;;  %1043 = vmatpush3.bf16.msra.mxu1 %v690_v60 }
 0x158   : > { %1044 = vmatprep.subr.bf16.mxu1 %v1316_v12 }
 0x159   : > { %v664_v59 = vadd.f32 %v1194_v48, %v663_v58 }
 0x15b   : > { %v665_v61 = vadd.f32 %v1196_v51, %v664_v59  ;;  %1045 = vmatpush3.bf16.msra.mxu1 %v689_v63 }
 0x15c   : > { %1046 = vmatprep.subr.bf16.mxu1 %v1316_v12 }
 0x15d   : > { %v666_v62 = vadd.f32 %v1190_v45, %v665_v61 }
 0x15f   : > { %v667_v0 = vadd.f32 %v1192_v47, %v666_v62  ;;  %1047 = vmatpush3.bf16.msra.mxu1 %v688_v2 }
 0x160   : > { %1048 = vmatprep.subr.bf16.mxu1 %v1316_v12 }
 0x161   : > { %v668_v1 = vrot.slane %v667_v0, 4 }
 0x163   : > { %v669_v3 = vadd.f32 %v668_v1, %v667_v0  ;;  %1049 = vmatpush3.bf16.msra.mxu1 %v687_v5 }
 0x164   : > { %1050 = vmatprep.subr.bf16.mxu1 %v1316_v12 }
 0x165   : > { %v670_v4 = vrot.slane %v669_v3, 2 }
 0x167   : > { %v671_v6 = vadd.f32 %v670_v4, %v669_v3  ;;  %1051 = vmatpush3.bf16.msra.mxu1 %v686_v9 }
 0x168   : > { %1052 = vmatprep.subr.bf16.mxu1 %v1316_v12 }
 0x169   : > { %v672_v8 = vrot.slane %v671_v6, 1 }
 0x16b   : > { %v673_v11 = vadd.f32 %v672_v8, %v671_v6  ;;  %1053 = vmatpush3.bf16.msra.mxu1 %v685_v14 }
 0x16d   : > { %v674_v13 = vadd.f32 %v673_v11, %v652_v10 }
 0x16e   : > { %1055 = vmatmul.mubr.bf16.vlgmr.msra.gmra.mxu1 %v684_v15 }
 0x16f   : > { %675 = vst [vmem:[#allocation3] sm:$0x1] %v674_v13 }
 0x22e   : > { %v727_v19 = vpop.f32.mrf.mxu1 }
 0x22f   : > { %v733_v20 = vadd.f32 %v727_v19, %v683_v18 }
 0x230   : > { %v1056_v24 = vpop.f32.mrf.mxu1  ;;  %739 = sbr.rel (%p993_p4) target bundleno = 789 (0x315), region = 52 }
 0x231   : > { %734 = vst [vmem:[#allocation4] sm:$0xff] %v733_v20 }
 0x232   : > { %v730_v25 = vpop.f32.mrf.mxu1 }
 0x234   : > { %v1057_v26 = vpop.f32.mrf.mxu1 }
 0x235   : > { %v740_v12 = vld [vmem:[#allocation3] sm:$0x1]  ;;  %v1318_v28 = vmov 0.0   ;;  %vm1319_vm3 = vmmov 0   ;;  %v1320_v22 = vmov 0  }
 0x236   : > { %1058 = vmatprep.subr.bf16.mxu0 %v1318_v28  ;;  %1202 = vrcp.f32 %v740_v12  ;;  %1060 = vmatprep.mubr.msk.bf16.mxu0 %vm1319_vm3, %v1318_v28  ;;  %v752_v17 = vld [vmem:[%s1634_s5] sm:$0xf] }
 0x237   : > { %1201 = vset.pattern.permute.xlu0 %v1320_v22  ;;  %v751_v21 = vld [vmem:[%s1633_s4] sm:$0x3] }
 0x238   : > { %755 = vperm.xlu0 %1201, %v752_v17   ;;  %v742_v29 = vld [vmem:[#allocation4] sm:$0xff] }
 0x239   : > { %v804_v36 = vld [vmem:[%s1459_s19] sm:$0xf] }
 0x243   : > { %v1203_v27 = vpop.eup %1202 }
 0x244   : > { %v747_v30 = vrot.slane %v1203_v27, %v1524_v53 }
 0x246   : > { %v749_v31 = vmul.f32 %v747_v30, %v742_v29 }
 0x248   : > { %v750_v32 = vpack.c.bf16 %v749_v31, %v749_v31 }
 0x24a   : > { %v762_v33 = vsel %vm470_vm0, %v750_v32, 0 }
 0x24b   : > { %1059 = vmatpush3.bf16.msra.mxu0 %v762_v33 }
 0x24e   : > { %1061 = vmatmul.mubr.msk.bf16.vlgmr.msra.gmra.mxu0 %vm445_vm1, %v751_v21 }
 0x2b3   : > { %v756_v34 = vpop.permute.xlu0 %755 }
 0x30e   : > { %v798_v35 = vpop.f32.mrf.mxu0 }
 0x30f   : > { %v799_v37 = vadd.f32 %v798_v35, %v756_v34 }
 0x310   : > { %v1062_v23 = vpop.f32.mrf.mxu0 }
 0x311   : > { %v805_v38 = vadd.f32 %v804_v36, %v799_v37 }
 0x312   : > { %v801_v39 = vpop.f32.mrf.mxu0 }
 0x313   : > { %806 = vst [vmem:[%s345_s10] sm:$0xf] %v805_v38 }
 0x314   : > { %v1063_v53 = vpop.f32.mrf.mxu0 }
 0x315 PF: > { %s996_s28 = sshll.u32 %s1296_s26, 1  ;;  %s823_s30 = sshll.u32 %s345_s10, 4  ;;  %s824_s30 = int_to_ptr.vmem [resolvable:$true] %s823_s30 }
 0x316   : > { %s819_s29 = sadd.s32 %s1292_s25, %s996_s28  ;;  %s1666_s18 = sld [smem:[#allocation20_spill]] }
 0x317   : > { %s997_s11 = sshll.u32 %s819_s29, 6  ;;  %s1667_s7 = sand.u32 1, %s1280_s22  }
 0x318   : > { %s808_s15 = scalar_lea.sflag [#allocation6], %s1667_s7  ;;  %s1204_s17 = scalar_lea.vmem %s824_s30, 64 }
 0x319   : > { %p1205_p5 = scmp.ne.s32.totalorder %s824_s30, %s1204_s17  ;;  %s1321_s8 = smov [#allocation5]  }
 0x31a   : > { %s1208_s14 = sshll.u32 %s1321_s8, 4  ;;  %s1209_s14 = int_to_ptr.vmem [resolvable:$false] %s1208_s14 }
 0x31b   : > { %p1206_p8 = pnand %p1205_p5, %p1419_p6  ;;  %s1210_s26 = scalar_lea.vmem %s1209_s14, 128 }
 0x31c   : > { %s821_s19 = scalar_lea.hbm %s1666_s18, %s997_s11  ;;  %p1211_p10 = scmp.lt.s32.totalorder %s824_s30, %s1209_s14 }
 0x31d   : > { %p1207_p9 = pneg %p1206_p8  ;;  %p1212_p11 = scmp.lt.s32.totalorder %s1210_s26, %s1204_s17 }
 0x31f   : > { %p1213_p12 = por %p1212_p11, %p1211_p10 }
 0x321   : > { %p1214_p13 = pnand %p1213_p12, %p1207_p9 }
 0x323   : > { %1217 = shalt.err (!%p1214_p13)
}
 0x324   : > { %s1218_s25 = scalar_lea.hbm %s821_s19, 64  ;;  %s1222_s9 = scalar_lea.hbm %s1666_s18, 256 }
 0x325   : > { %p1219_p0 = scmp.ne.s32.totalorder %s821_s19, %s1218_s25  ;;  %p1223_p3 = scmp.lt.s32.totalorder %s821_s19, %s1666_s18 }
 0x326   : > { %p1224_p4 = scmp.lt.s32.totalorder %s1222_s9, %s1218_s25 }
 0x327   : > { %p1220_p1 = pnand %p1219_p0, %p1419_p6 }
 0x328   : > { %p1225_p5 = por %p1224_p4, %p1223_p3 }
 0x329   : > { %p1221_p2 = pneg %p1220_p1 }
 0x32b   : > { %p1226_p8 = pnand %p1225_p5, %p1221_p2 }
 0x32d   : > { %1229 = shalt.err (!%p1226_p8)
}
 0x32e   : > { %1065 = dma.vmem_to_hbm [thread:$0]  (%p1419_p6), %s824_s30, 64, %s821_s19, %s808_s15  }
 0x32f PF: > { %s1668_s21 = sld [smem:[#allocation13_spill]] }
 0x330   : > { %s1669_s23 = sld [smem:[#allocation8_spill]] }
 0x335   : > { %p1071_p9 = scmp.ge.s32.totalorder %s1668_s21, 2 }
 0x336   : > { %s835_s28 = sand.u32 1, %s1669_s23  }
 0x337   : > { %p1068_p10 = pnand %p1071_p9, %p1426_p7  ;;  %s836_s29 = scalar_lea.sflag [#allocation6], %s835_s28 }
 0x339   : > { %p1069_p11 = pneg %p1068_p10 }
 0x33b   : > { %1271 = dma.done.wait (%p1069_p11), %s836_s29, 64  }
 0x33c   : > { %1273 = vsyncadd (%p1069_p11), %s836_s29, 4294967232  ;;  %s19_s30 = sadd.s32 1, %s1668_s21   ;;  %s1671_s11 = sld [smem:[#allocation9_spill]] }
 0x33d   : > { %p16_p12 = scmp.ge.s32.totalorder %s19_s30, 10   ;;  %s1672_s23 = sld [smem:[#allocation19_spill]] }
 0x33e   : > { %s1673_s24 = sld [smem:[#allocation10_spill]]  ;;  %s1679_s21 = smov %s1280_s22 }
 0x33f   : > { %s1674_s25 = sld [smem:[#allocation11_spill]]  ;;  %18 = sbr.rel (!%p16_p12) target bundleno = 8 (0x8), region = 96 }
 0x340   : > { %s1675_s26 = sld [smem:[#allocation12_spill]] }
 0x341   : > { %s1676_s27 = sld [smem:[#allocation14_spill]] }
 0x342   : > { %s1677_s28 = sld [smem:[#allocation16_spill]]  ;;  %s1680_s22 = smov %s1671_s11 }
 0x343   : > { %s1678_s29 = sld [smem:[#allocation18_spill]] }
 0x344   :  { %841 = vsyncpa [#allocation6], 1 }
 0x345   :  { %843 = vsyncpa [#allocation6 + $0x1], 1 }

</bundles_post_ra>
